<compile_context>
chip_gen: v5e
topology: v5e:2x2
jax: 0.10.0
libtpu: 0.0.40
codegen_flags: <defaults>
</compile_context>

<pallas_src>
import functools

import jax
import jax.numpy as jnp
from jax import lax
from jax.experimental import pallas as pl
from jax.experimental.pallas import tpu as pltpu


def _one_hot(ids, n_cls):
    """ids: (T_BLOCK, 1) int32 -> (T_BLOCK, n_cls) f32 one-hot."""
    col = lax.broadcasted_iota(jnp.int32, (ids.shape[0], n_cls), 1)
    return (col == ids).astype(jnp.float32)


def _gather_rows(ids_ref, table_ref):
    """Gather T_BLOCK table rows as one_hot @ table on the (idle) MXU."""
    onehot = _one_hot(ids_ref[...], table_ref.shape[1])
    return lax.dot_general(
        onehot, table_ref[...],
        dimension_numbers=(((1,), (0,)), ((), ())),
        preferred_element_type=jnp.float32,
        precision=lax.Precision.HIGHEST)


def _bigram_train_kernel(ids_ref, tgt_ref, table_ref, logits_ref, nll_ref,
                         *, n_valid):
    t_block = ids_ref.shape[0]
    v = table_ref.shape[1]

    logits = _gather_rows(ids_ref, table_ref)            # (T_BLOCK, V) f32
    logits_ref[...] = logits

    # Vectorized, max-stabilized cross entropy over the whole token block.
    m = jnp.max(logits, axis=-1, keepdims=True)
    lse = m + jnp.log(jnp.sum(jnp.exp(logits - m), axis=-1, keepdims=True))
    tgt_onehot = _one_hot(tgt_ref[...], v)
    picked = jnp.sum(tgt_onehot * logits, axis=-1, keepdims=True)
    nll = lse - picked                                    # (T_BLOCK, 1)

    # Mask padding tokens and reduce to a single per-block partial sum.
    row = (pl.program_id(0) * t_block
           + lax.broadcasted_iota(jnp.int32, (t_block, 1), 0))
    nll = jnp.where(row < n_valid, nll, 0.0)
    nll_ref[...] = jnp.reshape(jnp.sum(nll), (1, 1, 1))


def _bigram_infer_kernel(ids_ref, table_ref, logits_ref):
    logits_ref[...] = _gather_rows(ids_ref, table_ref)


def _block_size(n):
    # 256 fills the 2x256x256 MXU on v6e/v7x; keep 128 when N is small so
    # v7x can still split >=2 blocks across its two TensorCores (and 128 is
    # the natural multiple on v5e's 4x128x128 MXU).
    return 256 if n >= 512 else 128


@jax.jit
def _bigram_train(table, idx_flat, tgt_flat):
    V = table.shape[1]
    N = idx_flat.shape[0]
    t_block = _block_size(N)
    num_blocks = pl.cdiv(N, t_block)
    n_pad = num_blocks * t_block

    ids = jnp.zeros((n_pad, 1), jnp.int32).at[:N, 0].set(idx_flat)
    tgt = jnp.zeros((n_pad, 1), jnp.int32).at[:N, 0].set(tgt_flat)

    cost = pl.CostEstimate(
        flops=2 * n_pad * V * V,                 # one-hot @ table
        transcendentals=n_pad * V,               # exp in logsumexp
        bytes_accessed=(V * V * 4                # resident table read
                        + 2 * n_pad * 4          # ids + targets
                        + n_pad * V * 4          # logits write
                        + num_blocks * 4))       # nll partials

    logits_pad, nll_partials = pl.pallas_call(
        functools.partial(_bigram_train_kernel, n_valid=N),
        out_shape=(
            jax.ShapeDtypeStruct((n_pad, V), jnp.float32),
            jax.ShapeDtypeStruct((num_blocks, 1, 1), jnp.float32),
        ),
        grid_spec=pltpu.PrefetchScalarGridSpec(
            num_scalar_prefetch=0,
            grid=(num_blocks,),
            in_specs=[
                pl.BlockSpec((t_block, 1), lambda i: (i, 0)),   # token ids
                pl.BlockSpec((t_block, 1), lambda i: (i, 0)),   # targets
                pl.BlockSpec((V, V), lambda i: (0, 0)),         # VMEM-resident
            ],
            out_specs=(
                pl.BlockSpec((t_block, V), lambda i: (i, 0)),   # logits tile
                pl.BlockSpec((1, 1, 1), lambda i: (i, 0, 0)),   # nll partial
            ),
        ),
        compiler_params=pltpu.CompilerParams(
            dimension_semantics=("parallel",)),
        cost_estimate=cost,
    )(ids, tgt, table)

    logits = logits_pad[:N]
    loss = jnp.sum(nll_partials) / N            # mean over real tokens only
    return logits, loss


@jax.jit
def _bigram_infer(table, idx_flat):
    V = table.shape[1]
    N = idx_flat.shape[0]
    t_block = _block_size(N)
    num_blocks = pl.cdiv(N, t_block)
    n_pad = num_blocks * t_block

    ids = jnp.zeros((n_pad, 1), jnp.int32).at[:N, 0].set(idx_flat)

    cost = pl.CostEstimate(
        flops=2 * n_pad * V * V,
        transcendentals=0,
        bytes_accessed=V * V * 4 + n_pad * 4 + n_pad * V * 4)

    logits_pad = pl.pallas_call(
        _bigram_infer_kernel,
        out_shape=jax.ShapeDtypeStruct((n_pad, V), jnp.float32),
        grid_spec=pltpu.PrefetchScalarGridSpec(
            num_scalar_prefetch=0,
            grid=(num_blocks,),
            in_specs=[
                pl.BlockSpec((t_block, 1), lambda i: (i, 0)),
                pl.BlockSpec((V, V), lambda i: (0, 0)),
            ],
            out_specs=pl.BlockSpec((t_block, V), lambda i: (i, 0)),
        ),
        compiler_params=pltpu.CompilerParams(
            dimension_semantics=("parallel",)),
        cost_estimate=cost,
    )(ids, table)
    return logits_pad[:N]


def bigram_forward(table, idx, targets=None):
    """Mirrors BigramLanguageModel.forward.

    Returns (logits, loss):
      - targets is None  -> logits shape (B, T, V), loss is None
      - targets provided -> logits shape (B*T, V),  loss is scalar mean NLL
    """
    B, T = idx.shape
    V = table.shape[1]
    N = B * T
    idx_flat = idx.reshape(N).astype(jnp.int32)
    if targets is None:
        logits = _bigram_infer(table, idx_flat)
        return logits.reshape(B, T, V), None
    tgt_flat = targets.reshape(N).astype(jnp.int32)
    return _bigram_train(table, idx_flat, tgt_flat)


def _reference(table, idx, targets):
    B, T = idx.shape
    V = table.shape[1]
    logits = table[idx].reshape(B * T, V)
    tgt = targets.reshape(B * T)
    lse = jax.scipy.special.logsumexp(logits, axis=-1)
    picked = jnp.take_along_axis(logits, tgt[:, None], axis=-1)[:, 0]
    return logits, jnp.mean(lse - picked)


if __name__ == "__main__":
    V = 128   # vocabulary size
    B, T = 2, 8

    key = jax.random.PRNGKey(0)
    k_table, k_idx, k_tgt = jax.random.split(key, 3)

    # nn.Embedding default init: N(0, 1)
    table = jax.random.normal(k_table, (V, V), dtype=jnp.float32)
    idx = jax.random.randint(k_idx, (B, T), 0, V, dtype=jnp.int32)
    targets = jax.random.randint(k_tgt, (B, T), 0, V, dtype=jnp.int32)

    # Forward with targets (training path): logits (B*T, V), scalar loss.
    logits, loss = bigram_forward(table, idx, targets)
    jax.block_until_ready((logits, loss))

    # Forward without targets (inference path): logits (B, T, V), loss None.
    logits_inf, loss_inf = bigram_forward(table, idx, None)
    jax.block_until_ready(logits_inf)
    assert loss_inf is None
    assert logits_inf.shape == (B, T, V)

    # Check against a pure-JAX reference.
    ref_logits, ref_loss = _reference(table, idx, targets)
    assert logits.shape == (B * T, V)
    assert jnp.allclose(logits, ref_logits, atol=1e-5), "logits mismatch"
    assert jnp.allclose(loss, ref_loss, atol=1e-5), "loss mismatch"
    assert jnp.allclose(logits_inf.reshape(B * T, V), ref_logits, atol=1e-5)

    print("KERNEL_OK")
</pallas_src>

<mosaic_0001>
module attributes {stable_mosaic.version = 11 : i64} {
  func.func @_bigram_train_kernel(%arg0: i32, %arg1: memref<128x1xi32, #tpu.memory_space<vmem>>, %arg2: memref<128x1xi32, #tpu.memory_space<vmem>>, %arg3: memref<128x128xf32, #tpu.memory_space<vmem>>, %arg4: memref<128x128xf32, #tpu.memory_space<vmem>>, %arg5: memref<1x1x1xf32, #tpu.memory_space<vmem>>) attributes {dimension_semantics = [#tpu.dimension_semantics<parallel>], iteration_bounds = array<i64: 1>, scalar_prefetch = 0 : i64, scratch_operands = 0 : i64, tpu.core_type = #tpu.core_type<tc>, window_params = [{transform_indices = @transform_0, window_bounds = array<i64: 128, 1>}, {transform_indices = @transform_1, window_bounds = array<i64: 128, 1>}, {pipeline_mode = #tpu.pipeline_mode<synchronous>, transform_indices = @transform_2, window_bounds = array<i64: 128, 128>}, {transform_indices = @transform_3, window_bounds = array<i64: 128, 128>}, {transform_indices = @transform_4, window_bounds = array<i64: 1, 1, 1>}]} {
    %c0 = arith.constant 0 : index
    %c0_0 = arith.constant 0 : index
    %0 = vector.load %arg1[%c0, %c0_0] : memref<128x1xi32, #tpu.memory_space<vmem>>, vector<128x1xi32>
    %1 = tpu.iota {dimensions = array<i32: 1>} : vector<128x128xi32>
    %2 = vector.broadcast %0 : vector<128x1xi32> to vector<128x128xi32>
    %3 = arith.cmpi eq, %1, %2 : vector<128x128xi32>
    %4 = arith.extui %3 : vector<128x128xi1> to vector<128x128xi32>
    %5 = arith.sitofp %4 : vector<128x128xi32> to vector<128x128xf32>
    %c0_1 = arith.constant 0 : index
    %c0_2 = arith.constant 0 : index
    %6 = vector.load %arg3[%c0_1, %c0_2] : memref<128x128xf32, #tpu.memory_space<vmem>>, vector<128x128xf32>
    %cst = arith.constant dense<0.000000e+00> : vector<128x128xf32>
    %7 = tpu.matmul %5, %6, %cst {dimension_numbers = #tpu.dot_dimension_numbers<[1], [0], [0], [1], [0, 0, 1, 1], [], []>, precision = #tpu.contract_precision<fp32>} : vector<128x128xf32>, vector<128x128xf32>, vector<128x128xf32> -> vector<128x128xf32>
    %c0_3 = arith.constant 0 : index
    %c0_4 = arith.constant 0 : index
    %8 = vector.load %arg4[%c0_3, %c0_4] : memref<128x128xf32, #tpu.memory_space<vmem>>, vector<128x128xf32>
    tpu.vector_store %arg4[%c0_3, %c0_4], %7 {strides = array<i32>} : memref<128x128xf32, #tpu.memory_space<vmem>>, vector<128x128xf32>,
    %cst_5 = arith.constant dense<0xFF800000> : vector<128xf32>
    %9 = vector.multi_reduction <maximumf>, %7, %cst_5 [1] : vector<128x128xf32> to vector<128xf32>
    %10 = vector.shape_cast %9 : vector<128xf32> to vector<128x1xf32>
    %11 = vector.broadcast %10 : vector<128x1xf32> to vector<128x128xf32>
    %12 = arith.subf %7, %11 : vector<128x128xf32>
    %13 = math.exp %12 : vector<128x128xf32>
    %cst_6 = arith.constant dense<0.000000e+00> : vector<128xf32>
    %14 = vector.multi_reduction <add>, %13, %cst_6 [1] : vector<128x128xf32> to vector<128xf32>
    %15 = vector.shape_cast %14 : vector<128xf32> to vector<128x1xf32>
    %16 = math.log %15 : vector<128x1xf32>
    %17 = arith.addf %10, %16 : vector<128x1xf32>
    %c0_7 = arith.constant 0 : index
    %c0_8 = arith.constant 0 : index
    %18 = vector.load %arg2[%c0_7, %c0_8] : memref<128x1xi32, #tpu.memory_space<vmem>>, vector<128x1xi32>
    %19 = tpu.iota {dimensions = array<i32: 1>} : vector<128x128xi32>
    %20 = vector.broadcast %18 : vector<128x1xi32> to vector<128x128xi32>
    %21 = arith.cmpi eq, %19, %20 : vector<128x128xi32>
    %22 = arith.extui %21 : vector<128x128xi1> to vector<128x128xi32>
    %23 = arith.sitofp %22 : vector<128x128xi32> to vector<128x128xf32>
    %24 = arith.mulf %23, %7 : vector<128x128xf32>
    %cst_9 = arith.constant dense<0.000000e+00> : vector<128xf32>
    %25 = vector.multi_reduction <add>, %24, %cst_9 [1] : vector<128x128xf32> to vector<128xf32>
    %26 = vector.shape_cast %25 : vector<128xf32> to vector<128x1xf32>
    %27 = arith.subf %17, %26 : vector<128x1xf32>
    %c128_i32 = arith.constant 128 : i32
    %28 = arith.muli %arg0, %c128_i32 : i32
    %29 = tpu.iota {dimensions = array<i32: 0>} : vector<128x1xi32>
    %30 = vector.broadcast %28 : i32 to vector<128x1xi32>
    %31 = arith.addi %30, %29 : vector<128x1xi32>
    %c16_i32 = arith.constant 16 : i32
    %32 = vector.broadcast %c16_i32 : i32 to vector<128x1xi32>
    %33 = arith.cmpi slt, %31, %32 : vector<128x1xi32>
    %cst_10 = arith.constant 0.000000e+00 : f32
    %34 = vector.broadcast %cst_10 : f32 to vector<128x1xf32>
    %35 = arith.select %33, %27, %34 : vector<128x1xi1>, vector<128x1xf32>
    %36 = vector.shape_cast %35 : vector<128x1xf32> to vector<1x128x1xf32>
    %cst_11 = arith.constant dense<0.000000e+00> : vector<1xf32>
    %37 = vector.multi_reduction <add>, %36, %cst_11 [1, 2] : vector<1x128x1xf32> to vector<1xf32>
    %38 = vector.shape_cast %37 : vector<1xf32> to vector<1x1x1xf32>
    %39 = vector.extract %38[0, 0, 0] : f32 from vector<1x1x1xf32>
    %40 = vector.broadcast %39 : f32 to vector<1x1x1xf32>
    %c0_12 = arith.constant 0 : index
    %c0_13 = arith.constant 0 : index
    %c0_14 = arith.constant 0 : index
    %41 = vector.load %arg5[%c0_12, %c0_13, %c0_14] : memref<1x1x1xf32, #tpu.memory_space<vmem>>, vector<1x1x1xf32>
    tpu.vector_store %arg5[%c0_12, %c0_13, %c0_14], %40 {strides = array<i32>} : memref<1x1x1xf32, #tpu.memory_space<vmem>>, vector<1x1x1xf32>,
    return
  }
  func.func @transform_0(%arg0: i32) -> (i32, i32) {
    %c0_i32 = arith.constant 0 : i32
    %c0_i32_0 = arith.constant 0 : i32
    return %arg0, %c0_i32 : i32, i32
  }
  func.func @transform_1(%arg0: i32) -> (i32, i32) {
    %c0_i32 = arith.constant 0 : i32
    %c0_i32_0 = arith.constant 0 : i32
    return %arg0, %c0_i32 : i32, i32
  }
  func.func @transform_2(%arg0: i32) -> (i32, i32) {
    %c0_i32 = arith.constant 0 : i32
    %c0_i32_0 = arith.constant 0 : i32
    %c0_i32_1 = arith.constant 0 : i32
    return %c0_i32, %c0_i32_0 : i32, i32
  }
  func.func @transform_3(%arg0: i32) -> (i32, i32) {
    %c0_i32 = arith.constant 0 : i32
    %c0_i32_0 = arith.constant 0 : i32
    return %arg0, %c0_i32 : i32, i32
  }
  func.func @transform_4(%arg0: i32) -> (i32, i32, i32) {
    %c0_i32 = arith.constant 0 : i32
    %c0_i32_0 = arith.constant 0 : i32
    %c0_i32_1 = arith.constant 0 : i32
    return %arg0, %c0_i32, %c0_i32_0 : i32, i32, i32
  }
}

</mosaic_0001>

<bundles_post_ra>
// kernel: _bigram_train.1
= control target key start
LH: loop header
LB: loop body
LE: loop exit
PB: predicated region body
PF: predicated region fallthrough
CT: control target
= control target key end

     0   :  { %v1591_v2 = vmov 0   ;;  %s2561_s0 = inlined_call_operand.vmem [shape: s32[128,1], index: 0, kind: input, shape index: {}]   ;;  %s2562_s1 = inlined_call_operand.vmem [shape: s32[128,1], index: 1, kind: input, shape index: {}]   ;;  %s2563_s2 = inlined_call_operand.vmem [shape: f32[128,128], index: 2, kind: input, shape index: {}]   ;;  %s2564_s3 = inlined_call_operand.vmem [shape: f32[128,128], index: 3, kind: output, shape index: {0}]   ;;  %s2565_s4 = inlined_call_operand.hbm [shape: f32[1,1,1], index: 4, kind: output, shape index: {1}]  }
   0x1   :  { %v25_v0 = vld [vmem:[%s2561_s0 + $0x40] sm:$0xff]  ;;  %1555 = vset.pattern.permute.xlu1 %v1591_v2  ;;  %1554 = vset.pattern.permute.xlu0 %v1591_v2  ;;  %v18_v3 = vld [vmem:[%s2561_s0 + $0x8] sm:$0xff] }
   0x2   :  { %v17_v1 = vld [vmem:[%s2561_s0] sm:$0xff]  ;;  %60 = vperm.xlu0 %1554, %v25_v0   ;;  %1556 = vset.pattern.permute.xlu2 %v1591_v2 }
   0x3   :  { %36 = vperm.xlu1 %1555, %v17_v1   ;;  %39 = vperm.xlu2 %1556, %v18_v3  }
   0x4   :  { %10 = vsyncpa [#allocation3], 0  ;;  %v26_v4 = vld [vmem:[%s2561_s0 + $0x48] sm:$0xff]  ;;  %v27_v5 = vld [vmem:[%s2561_s0 + $0x50] sm:$0xff]  ;;  %s1425_s7 = sshll.u32 %s2565_s4, 4  ;;  %s1426_s7 = int_to_ptr.hbm [resolvable:$true] %s1425_s7 }
   0x5   :  { %v28_v6 = vld [vmem:[%s2561_s0 + $0x58] sm:$0xff]  ;;  %v19_v7 = vld [vmem:[%s2561_s0 + $0x10] sm:$0xff]  ;;  %v29_v8 = vld [vmem:[%s2561_s0 + $0x60] sm:$0xff] }
   0x6   :  { %v20_v9 = vld [vmem:[%s2561_s0 + $0x18] sm:$0xff]  ;;  %v30_v10 = vld [vmem:[%s2561_s0 + $0x68] sm:$0xff]  ;;  %v21_v11 = vld [vmem:[%s2561_s0 + $0x20] sm:$0xff] }
   0x7   :  { %v31_v12 = vld [vmem:[%s2561_s0 + $0x70] sm:$0xff]  ;;  %v146_v13 = vld [vmem:[%s2563_s2 + $0x78] sm:$0xff]  ;;  %v144_v15 = vld [vmem:[%s2563_s2 + $0x68] sm:$0xff] }
   0x8   :  { %v145_v14 = vld [vmem:[%s2563_s2 + $0x70] sm:$0xff]  ;;  %v1665_v16 = vand.u32 4294901760, %v146_v13  ;;  %v1669_v18 = vand.u32 4294901760, %v144_v15  ;;  %v143_v19 = vld [vmem:[%s2563_s2 + $0x60] sm:$0xff]  ;;  %v142_v20 = vld [vmem:[%s2563_s2 + $0x58] sm:$0xff] }
   0x9   :  { %v1667_v17 = vand.u32 4294901760, %v145_v14  ;;  %v141_v21 = vld [vmem:[%s2563_s2 + $0x50] sm:$0xff]  ;;  %v1680_v22 = vand.u32 4294901760, %v143_v19  ;;  %v1682_v23 = vand.u32 4294901760, %v142_v20  ;;  %v22_v30 = vld [vmem:[%s2561_s0 + $0x28] sm:$0xff]  ;;  %v32_v31 = vld [vmem:[%s2561_s0 + $0x78] sm:$0xff] }
   0xa   :  { %63 = vperm.xlu0 %1554, %v26_v4   ;;  %v1684_v24 = vand.u32 4294901760, %v141_v21  ;;  %v1687_v25 = vsub.f32 %v146_v13, %v1665_v16  ;;  %v1693_v27 = vsub.f32 %v144_v15, %v1669_v18  ;;  %148 = vmatpush.msra.mxu0 %v1665_v16  ;;  %v23_v37 = vld [vmem:[%s2561_s0 + $0x30] sm:$0xff]  ;;  %v24_v48 = vld [vmem:[%s2561_s0 + $0x38] sm:$0xff]  ;;  %v1129_v53 = vld [vmem:[%s2562_s1] sm:$0xff] }
   0xb   :  { %66 = vperm.xlu1 %1555, %v27_v5   ;;  %69 = vperm.xlu2 %1556, %v28_v6   ;;  %v1690_v26 = vsub.f32 %v145_v14, %v1667_v17  ;;  %v1698_v28 = vsub.f32 %v143_v19, %v1680_v22  ;;  %v1701_v29 = vsub.f32 %v142_v20, %v1682_v23  ;;  %v1130_v54 = vld [vmem:[%s2562_s1 + $0x8] sm:$0xff]  ;;  %v139_v57 = vld [vmem:[%s2563_s2 + $0x40] sm:$0xff]  ;;  %v138_v60 = vld [vmem:[%s2563_s2 + $0x38] sm:$0xff] }
   0xc   :  { %1516 = vmatpush.msra.mxu2 %v1665_v16  ;;  %v310_v32 = vand.u32 4294901760, %v1687_v25  ;;  %v322_v34 = vand.u32 4294901760, %v1693_v27  ;;  %v1713_v35 = vsub.f32 %v141_v21, %v1684_v24  ;;  %150 = vmatpush.msra.mxu0 %v1667_v17  ;;  %v140_v55 = vld [vmem:[%s2563_s2 + $0x48] sm:$0xff]  ;;  %v1769_v59 = vand.u32 4294901760, %v139_v57  ;;  %v137_v0 = vld [vmem:[%s2563_s2 + $0x30] sm:$0xff]  ;;  %v134_v20 = vld [vmem:[%s2563_s2 + $0x18] sm:$0xff] }
   0xd   :  { %v316_v33 = vand.u32 4294901760, %v1690_v26  ;;  %v328_v36 = vand.u32 4294901760, %v1698_v28  ;;  %v334_v41 = vand.u32 4294901760, %v1701_v29  ;;  %v1761_v56 = vand.u32 4294901760, %v140_v55  ;;  %v136_v5 = vld [vmem:[%s2563_s2 + $0x28] sm:$0xff] }
   0xe   :  { %1517 = vmatpush.msra.mxu2 %v1667_v17  ;;  %v311_v38 = vsub.f32 %v1687_v25, %v310_v32  ;;  %v323_v40 = vsub.f32 %v1693_v27, %v322_v34  ;;  %152 = vmatpush.msra.mxu0 %v1669_v18  ;;  %v340_v45 = vand.u32 4294901760, %v1713_v35  ;;  %v1778_v62 = vsub.f32 %v139_v57, %v1769_v59 }
   0xf   :  { %v317_v39 = vsub.f32 %v1690_v26, %v316_v33  ;;  %v329_v44 = vsub.f32 %v1698_v28, %v328_v36  ;;  %v335_v47 = vsub.f32 %v1701_v29, %v334_v41  ;;  %v1767_v58 = vsub.f32 %v140_v55, %v1761_v56 }
  0x10   :  { %1518 = vmatpush.msra.mxu2 %v1669_v18  ;;  %v312_v42 = vand.u32 4294901760, %v311_v38  ;;  %154 = vmatpush.msra.mxu0 %v1680_v22  ;;  %v324_v46 = vand.u32 4294901760, %v323_v40  ;;  %v341_v50 = vsub.f32 %v1713_v35, %v340_v45  ;;  %v1780_v63 = vand.u32 4294901760, %v138_v60 }
  0x11   :  { %v318_v43 = vand.u32 4294901760, %v317_v39  ;;  %v330_v49 = vand.u32 4294901760, %v329_v44  ;;  %v336_v51 = vand.u32 4294901760, %v335_v47  ;;  %v346_v61 = vand.u32 4294901760, %v1767_v58  ;;  %v133_v39 = vld [vmem:[%s2563_s2 + $0x10] sm:$0xff]  ;;  %v132_v47 = vld [vmem:[%s2563_s2 + $0x8] sm:$0xff] }
  0x12   :  { %42 = vperm.xlu0 %1554, %v19_v7   ;;  %1519 = vmatpush.msra.mxu2 %v1680_v22  ;;  %v342_v52 = vand.u32 4294901760, %v341_v50  ;;  %v352_v2 = vand.u32 4294901760, %v1778_v62  ;;  %v1792_v3 = vsub.f32 %v138_v60, %v1780_v63  ;;  %v1794_v4 = vand.u32 4294901760, %v137_v0 }
  0x13   :  { %72 = vperm.xlu1 %1555, %v29_v8   ;;  %45 = vperm.xlu2 %1556, %v20_v9   ;;  %v347_v1 = vsub.f32 %v1767_v58, %v346_v61  ;;  %v1847_v44 = vand.u32 4294901760, %v133_v39 }
  0x14   :  { %313 = vmatpush.msra.mxu1 %v312_v42  ;;  %1532 = vmatpush.msra.mxu3 %v312_v42  ;;  %v353_v7 = vsub.f32 %v1778_v62, %v352_v2  ;;  %v358_v8 = vand.u32 4294901760, %v1792_v3  ;;  %v1806_v9 = vsub.f32 %v137_v0, %v1794_v4 }
  0x15   :  { %156 = vmatpush.msra.mxu0 %v1682_v23  ;;  %1520 = vmatpush.msra.mxu2 %v1682_v23  ;;  %v348_v6 = vand.u32 4294901760, %v347_v1  ;;  %v1862_v50 = vsub.f32 %v133_v39, %v1847_v44 }
  0x16   :  { %319 = vmatpush.msra.mxu1 %v318_v43  ;;  %1533 = vmatpush.msra.mxu3 %v318_v43  ;;  %v359_v13 = vsub.f32 %v1792_v3, %v358_v8  ;;  %v364_v14 = vand.u32 4294901760, %v1806_v9 }
  0x17   :  { %158 = vmatpush.msra.mxu0 %v1684_v24  ;;  %1521 = vmatpush.msra.mxu2 %v1684_v24  ;;  %v388_v57 = vand.u32 4294901760, %v1862_v50 }
  0x18   :  { %325 = vmatpush.msra.mxu1 %v324_v46  ;;  %1534 = vmatpush.msra.mxu3 %v324_v46  ;;  %v360_v21 = vand.u32 4294901760, %v359_v13 }
  0x19   :  { %160 = vmatpush.msra.mxu0 %v1761_v56  ;;  %1522 = vmatpush.msra.mxu2 %v1761_v56 }
  0x1a   :  { %75 = vperm.xlu0 %1554, %v30_v10   ;;  %331 = vmatpush.msra.mxu1 %v330_v49  ;;  %v1810_v10 = vand.u32 4294901760, %v136_v5 }
  0x1b   :  { %48 = vperm.xlu1 %1555, %v21_v11   ;;  %78 = vperm.xlu2 %1556, %v31_v12   ;;  %v135_v11 = vld [vmem:[%s2563_s2 + $0x20] sm:$0xff]  ;;  %v354_v12 = vand.u32 4294901760, %v353_v7 }
  0x1c   :  { %1535 = vmatpush.msra.mxu3 %v330_v49  ;;  %337 = vmatpush.msra.mxu1 %v336_v51  ;;  %v1819_v15 = vand.u32 4294901760, %v135_v11  ;;  %v1822_v19 = vsub.f32 %v136_v5, %v1810_v10  ;;  %v389_v5 = vsub.f32 %v1862_v50, %v388_v57 }
  0x1d   :  { %162 = vmatpush.msra.mxu0 %v1769_v59  ;;  %1523 = vmatpush.msra.mxu2 %v1769_v59 }
  0x1e   :  { %1536 = vmatpush.msra.mxu3 %v336_v51  ;;  %343 = vmatpush.msra.mxu1 %v342_v52  ;;  %v370_v38 = vand.u32 4294901760, %v1822_v19  ;;  %v1864_v51 = vand.u32 4294901760, %v132_v47 }
  0x1f   :  { %164 = vmatpush.msra.mxu0 %v1780_v63  ;;  %1524 = vmatpush.msra.mxu2 %v1780_v63 }
  0x20   :  { %1537 = vmatpush.msra.mxu3 %v342_v52  ;;  %349 = vmatpush.msra.mxu1 %v348_v6  ;;  %v371_v46 = vsub.f32 %v1822_v19, %v370_v38  ;;  %v1876_v60 = vsub.f32 %v132_v47, %v1864_v51 }
  0x21   :  { %166 = vmatpush.msra.mxu0 %v1794_v4  ;;  %1525 = vmatpush.msra.mxu2 %v1794_v4 }
  0x22   :  { %51 = vperm.xlu0 %1554, %v22_v30   ;;  %1538 = vmatpush.msra.mxu3 %v348_v6  ;;  %v365_v30 = vsub.f32 %v1806_v9, %v364_v14  ;;  %v372_v52 = vand.u32 4294901760, %v371_v46  ;;  %v394_v6 = vand.u32 4294901760, %v1876_v60 }
  0x23   :  { %81 = vperm.xlu1 %1555, %v32_v31   ;;  %54 = vperm.xlu2 %1556, %v23_v37   ;;  %v1833_v31 = vsub.f32 %v135_v11, %v1819_v15  ;;  %v1835_v37 = vand.u32 4294901760, %v134_v20  ;;  %v390_v11 = vand.u32 4294901760, %v389_v5 }
  0x24   :  { %168 = vmatpush.msra.mxu0 %v1810_v10  ;;  %1526 = vmatpush.msra.mxu2 %v1810_v10  ;;  %v366_v40 = vand.u32 4294901760, %v365_v30 }
  0x25   :  { %355 = vmatpush.msra.mxu1 %v354_v12  ;;  %1539 = vmatpush.msra.mxu3 %v354_v12  ;;  %v376_v42 = vand.u32 4294901760, %v1833_v31  ;;  %v1845_v43 = vsub.f32 %v134_v20, %v1835_v37  ;;  %v395_v12 = vsub.f32 %v1876_v60, %v394_v6 }
  0x26   :  { %170 = vmatpush.msra.mxu0 %v1819_v15  ;;  %1527 = vmatpush.msra.mxu2 %v1819_v15 }
  0x27   :  { %361 = vmatpush.msra.mxu1 %v360_v21  ;;  %1540 = vmatpush.msra.mxu3 %v360_v21  ;;  %v382_v49 = vand.u32 4294901760, %v1845_v43  ;;  %v396_v20 = vand.u32 4294901760, %v395_v12 }
  0x28   :  { %172 = vmatpush.msra.mxu0 %v1835_v37  ;;  %1528 = vmatpush.msra.mxu2 %v1835_v37 }
  0x29   :  { %367 = vmatpush.msra.mxu1 %v366_v40  ;;  %1541 = vmatpush.msra.mxu3 %v366_v40  ;;  %v383_v55 = vsub.f32 %v1845_v43, %v382_v49 }
  0x2a   :  { %57 = vperm.xlu0 %1554, %v24_v48   ;;  %v377_v48 = vsub.f32 %v1833_v31, %v376_v42  ;;  %174 = vmatpush.msra.mxu0 %v1847_v44 }
  0x2b   :  { %1529 = vmatpush.msra.mxu2 %v1847_v44  ;;  %373 = vmatpush.msra.mxu1 %v372_v52  ;;  %v384_v1 = vand.u32 4294901760, %v383_v55 }
  0x2c   :  { %1542 = vmatpush.msra.mxu3 %v372_v52  ;;  %176 = vmatpush.msra.mxu0 %v1864_v51 }
  0x2d   :  { %1530 = vmatpush.msra.mxu2 %v1864_v51 }
  0x32   :  { %1146 = vperm.xlu0 %1554, %v1129_v53   ;;  %v131_v53 = vld [vmem:[%s2563_s2] sm:$0xff] }
  0x33   :  { %v1878_v0 = vand.u32 4294901760, %v131_v53 }
  0x35   :  { %v1887_v7 = vsub.f32 %v131_v53, %v1878_v0  ;;  %178 = vmatpush.msra.mxu0 %v1878_v0  ;;  %1531 = vmatpush.msra.mxu2 %v1878_v0 }
  0x37   :  { %v400_v13 = vand.u32 4294901760, %v1887_v7  ;;  %471 = vmatpush.msrb.mxu2 %v1687_v25  ;;  %730 = vmatpush.msrb.mxu0 %v310_v32 }
  0x39   :  { %v401_v21 = vsub.f32 %v1887_v7, %v400_v13  ;;  %474 = vmatpush.msrb.mxu2 %v1690_v26  ;;  %734 = vmatpush.msrb.mxu0 %v316_v33 }
  0x3a   :  { %1149 = vperm.xlu0 %1554, %v1130_v54   ;;  %v378_v54 = vand.u32 4294901760, %v377_v48 }
  0x3b   :  { %v402_v30 = vand.u32 4294901760, %v401_v21  ;;  %477 = vmatpush.msrb.mxu2 %v1693_v27  ;;  %738 = vmatpush.msrb.mxu0 %v322_v34 }
  0x3c   :  { %379 = vmatpush.msra.mxu1 %v378_v54  ;;  %1543 = vmatpush.msra.mxu3 %v378_v54 }
  0x3d   :  { %480 = vmatpush.msrb.mxu2 %v1698_v28  ;;  %742 = vmatpush.msrb.mxu0 %v328_v36  ;;  %v1593_v28 = vmov 1.0  }
  0x3e   :  { %385 = vmatpush.msra.mxu1 %v384_v1  ;;  %1544 = vmatpush.msra.mxu3 %v384_v1 }
  0x3f   :  { %483 = vmatpush.msrb.mxu2 %v1701_v29  ;;  %746 = vmatpush.msrb.mxu0 %v334_v41 }
  0x40   :  { %391 = vmatpush.msra.mxu1 %v390_v11  ;;  %1545 = vmatpush.msra.mxu3 %v390_v11 }
  0x41   :  { %486 = vmatpush.msrb.mxu2 %v1713_v35  ;;  %750 = vmatpush.msrb.mxu0 %v340_v45 }
  0x42   :  { %397 = vmatpush.msra.mxu1 %v396_v20  ;;  %1546 = vmatpush.msra.mxu3 %v396_v20 }
  0x43   :  { %489 = vmatpush.msrb.mxu2 %v1767_v58  ;;  %754 = vmatpush.msrb.mxu0 %v346_v61 }
  0x44   :  { %403 = vmatpush.msra.mxu1 %v402_v30  ;;  %1547 = vmatpush.msra.mxu3 %v402_v30 }
  0x45   :  { %492 = vmatpush.msrb.mxu2 %v1778_v62  ;;  %758 = vmatpush.msrb.mxu0 %v352_v2 }
  0x46   :  { %599 = vmatpush.msrb.mxu3 %v1665_v16  ;;  %857 = vmatpush.msrb.mxu1 %v1665_v16  ;;  %v33_v16 = vlaneseq }
  0x47   :  { %495 = vmatpush.msrb.mxu2 %v1792_v3  ;;  %762 = vmatpush.msrb.mxu0 %v358_v8 }
  0x48   :  { %601 = vmatpush.msrb.mxu3 %v1667_v17  ;;  %859 = vmatpush.msrb.mxu1 %v1667_v17 }
  0x49   :  { %498 = vmatpush.msrb.mxu2 %v1806_v9  ;;  %766 = vmatpush.msrb.mxu0 %v364_v14 }
  0x4a   :  { %603 = vmatpush.msrb.mxu3 %v1669_v18  ;;  %861 = vmatpush.msrb.mxu1 %v1669_v18  ;;  %v1969_v18 = vand.u32 127, %v33_v16 }
  0x4b   :  { %501 = vmatpush.msrb.mxu2 %v1822_v19  ;;  %770 = vmatpush.msrb.mxu0 %v370_v38 }
  0x4c   :  { %605 = vmatpush.msrb.mxu3 %v1680_v22  ;;  %863 = vmatpush.msrb.mxu1 %v1680_v22  ;;  %v1592_v22 = vmov 0.0  }
  0x4d   :  { %504 = vmatpush.msrb.mxu2 %v1833_v31  ;;  %774 = vmatpush.msrb.mxu0 %v376_v42 }
  0x4e   :  { %607 = vmatpush.msrb.mxu3 %v1682_v23  ;;  %865 = vmatpush.msrb.mxu1 %v1682_v23 }
  0x4f   :  { %507 = vmatpush.msrb.mxu2 %v1845_v43  ;;  %778 = vmatpush.msrb.mxu0 %v382_v49 }
  0x50   :  { %609 = vmatpush.msrb.mxu3 %v1684_v24  ;;  %867 = vmatpush.msrb.mxu1 %v1684_v24 }
  0x51   :  { %510 = vmatpush.msrb.mxu2 %v1862_v50  ;;  %782 = vmatpush.msrb.mxu0 %v388_v57 }
  0x52   :  { %611 = vmatpush.msrb.mxu3 %v1761_v56  ;;  %869 = vmatpush.msrb.mxu1 %v1761_v56 }
  0x53   :  { %513 = vmatpush.msrb.mxu2 %v1876_v60  ;;  %786 = vmatpush.msrb.mxu0 %v394_v6 }
  0x54   :  { %613 = vmatpush.msrb.mxu3 %v1769_v59  ;;  %871 = vmatpush.msrb.mxu1 %v1769_v59 }
  0x55   :  { %516 = vmatpush.msrb.mxu2 %v1887_v7  ;;  %790 = vmatpush.msrb.mxu0 %v400_v13 }
  0x56   :  { %615 = vmatpush.msrb.mxu3 %v1780_v63  ;;  %873 = vmatpush.msrb.mxu1 %v1780_v63 }
  0x58   :  { %617 = vmatpush.msrb.mxu3 %v1794_v4  ;;  %875 = vmatpush.msrb.mxu1 %v1794_v4 }
  0x5a   :  { %619 = vmatpush.msrb.mxu3 %v1810_v10  ;;  %877 = vmatpush.msrb.mxu1 %v1810_v10 }
  0x5c   :  { %621 = vmatpush.msrb.mxu3 %v1819_v15  ;;  %879 = vmatpush.msrb.mxu1 %v1819_v15 }
  0x5d   :  { %v1964_v17 = vpop.permute.xlu2 %39 }
  0x5e   :  { %623 = vmatpush.msrb.mxu3 %v1835_v37  ;;  %881 = vmatpush.msrb.mxu1 %v1835_v37  ;;  %vm84_vm0 = vcmp.eq.s32.totalorder %v1969_v18, %v1964_v17 }
  0x5f   :  { %v1437_v23 = vsel %vm84_vm0, 1.0, %v1592_v22 }
  0x60   :  { %625 = vmatpush.msrb.mxu3 %v1847_v44  ;;  %883 = vmatpush.msrb.mxu1 %v1847_v44  ;;  %v2011_v29 = vsub.f32 %v1437_v23, %v1437_v23 }
  0x62   :  { %627 = vmatpush.msrb.mxu3 %v1864_v51  ;;  %885 = vmatpush.msrb.mxu1 %v1864_v51  ;;  %v189_v56 = vand.u32 4294901760, %v2011_v29 }
  0x64   :  { %629 = vmatpush.msrb.mxu3 %v1878_v0  ;;  %887 = vmatpush.msrb.mxu1 %v1878_v0  ;;  %v190_v4 = vsub.f32 %v2011_v29, %v189_v56 }
  0x65   :  { %v2018_v34 = vpop.permute.xlu2 %69 }
  0x66   :  { %vm94_vm5 = vcmp.eq.s32.totalorder %v1969_v18, %v2018_v34  ;;  %v191_v14 = vand.u32 4294901760, %v190_v4 }
  0x67   :  { %v1447_v37 = vsel %vm94_vm5, 1.0, %v1592_v22 }
  0x68   :  { %v2099_v44 = vsub.f32 %v1447_v37, %v1447_v37 }
  0x6a   :  { %v269_v52 = vand.u32 4294901760, %v2099_v44 }
  0x6c   :  { %v270_v1 = vsub.f32 %v2099_v44, %v269_v52 }
  0x6d   :  { %v2063_v10 = vpop.permute.xlu2 %45 }
  0x6e   :  { %vm86_vm6 = vcmp.eq.s32.totalorder %v1969_v18, %v2063_v10  ;;  %v271_v12 = vand.u32 4294901760, %v270_v1 }
  0x6f   :  { %v1439_v40 = vsel %vm86_vm6, 1.0, %v1592_v22 }
  0x70   :  { %v2101_v46 = vsub.f32 %v1439_v40, %v1439_v40 }
  0x72   :  { %v205_v55 = vand.u32 4294901760, %v2101_v46 }
  0x74   :  { %v1985_v24 = vpop.permute.xlu0 %60  ;;  %v206_v7 = vsub.f32 %v2101_v46, %v205_v55 }
  0x75   :  { %v1987_v25 = vpop.permute.xlu1 %36  ;;  %vm91_vm1 = vcmp.eq.s32.totalorder %v1969_v18, %v1985_v24  ;;  %v2120_v57 = vpop.permute.xlu2 %78 }
  0x76   :  { %vm83_vm2 = vcmp.eq.s32.totalorder %v1969_v18, %v1987_v25  ;;  %v1444_v26 = vsel %vm91_vm1, 1.0, %v1592_v22  ;;  %1460 = vmatmul.msk.f32.vlgmr.msra.gmra.mxu3 %vm91_vm1, %v1593_v28  ;;  %v207_v13 = vand.u32 4294901760, %v206_v7  ;;  %vm97_vm12 = vcmp.eq.s32.totalorder %v1969_v18, %v2120_v57 }
  0x77   :  { %v1436_v27 = vsel %vm83_vm2, 1.0, %v1592_v22  ;;  %1452 = vmatmul.msk.f32.vlgmr.msra.gmra.mxu1 %vm83_vm2, %v1593_v28  ;;  %v2013_v32 = vsub.f32 %v1444_v26, %v1444_v26  ;;  %v1450_v4 = vsel %vm97_vm12, 1.0, %v1592_v22 }
  0x78   :  { %v2015_v33 = vsub.f32 %v1436_v27, %v1436_v27 }
  0x79   :  { %v245_v36 = vand.u32 4294901760, %v2013_v32 }
  0x7a   :  { %v181_v35 = vand.u32 4294901760, %v2015_v33 }
  0x7b   :  { %v246_v45 = vsub.f32 %v2013_v32, %v245_v36 }
  0x7c   :  { %v182_v41 = vsub.f32 %v2015_v33, %v181_v35  ;;  %v2029_v58 = vpop.permute.xlu0 %63 }
  0x7d   :  { %v2031_v59 = vpop.permute.xlu1 %66  ;;  %vm92_vm3 = vcmp.eq.s32.totalorder %v1969_v18, %v2029_v58  ;;  %v247_v62 = vand.u32 4294901760, %v246_v45  ;;  %v2172_v23 = vpop.permute.xlu2 %54 }
  0x7e   :  { %vm93_vm4 = vcmp.eq.s32.totalorder %v1969_v18, %v2031_v59  ;;  %v183_v61 = vand.u32 4294901760, %v182_v41  ;;  %v1445_v63 = vsel %vm92_vm3, 1.0, %v1592_v22  ;;  %1461 = vmatmul.msk.f32.gmra.mxu3 %vm92_vm3, %v1593_v28  ;;  %vm89_vm13 = vcmp.eq.s32.totalorder %v1969_v18, %v2172_v23 }
  0x7f   :  { %v1446_v2 = vsel %vm93_vm4, 1.0, %v1592_v22  ;;  %1453 = vmatmul.msk.f32.gmra.mxu1 %vm84_vm0, %v1593_v28  ;;  %v2053_v3 = vsub.f32 %v1445_v63, %v1445_v63  ;;  %248 = vmatmul.f32.vlgmr.msra.gmra.mxu2 %v247_v62 }
  0x80   :  { %184 = vmatmul.f32.vlgmr.msra.gmra.mxu0 %v183_v61  ;;  %v2058_v8 = vsub.f32 %v1446_v2, %v1446_v2 }
  0x81   :  { %v253_v9 = vand.u32 4294901760, %v2053_v3 }
  0x82   :  { %v261_v39 = vand.u32 4294901760, %v2058_v8 }
  0x83   :  { %v254_v15 = vsub.f32 %v2053_v3, %v253_v9 }
  0x84   :  { %v2070_v19 = vpop.permute.xlu0 %42  ;;  %v262_v48 = vsub.f32 %v2058_v8, %v261_v39 }
  0x85   :  { %v2072_v31 = vpop.permute.xlu1 %72  ;;  %vm85_vm7 = vcmp.eq.s32.totalorder %v1969_v18, %v2070_v19  ;;  %v255_v38 = vand.u32 4294901760, %v254_v15 }
  0x86   :  { %v1438_v42 = vsel %vm85_vm7, 1.0, %v1592_v22  ;;  %1462 = vmatmul.msk.f32.gmra.mxu3 %vm93_vm4, %v1593_v28  ;;  %vm95_vm8 = vcmp.eq.s32.totalorder %v1969_v18, %v2072_v31  ;;  %v263_v54 = vand.u32 4294901760, %v262_v48 }
  0x87   :  { %1454 = vmatmul.msk.f32.gmra.mxu1 %vm85_vm7, %v1593_v28  ;;  %v2097_v43 = vsub.f32 %v1438_v42, %v1438_v42  ;;  %256 = vmatmul.f32.gmra.mxu2 %v255_v38  ;;  %v1448_v60 = vsel %vm95_vm8, 1.0, %v1592_v22  ;;  %v2210_v38 = vsub.f32 %v1450_v4, %v1450_v4 }
  0x88   :  { %192 = vmatmul.f32.gmra.mxu0 %v191_v14  ;;  %v2141_v5 = vsub.f32 %v1448_v60, %v1448_v60  ;;  %v1442_v14 = vsel %vm89_vm13, 1.0, %v1592_v22 }
  0x89   :  { %v197_v47 = vand.u32 4294901760, %v2097_v43  ;;  %v228_v40 = vsub.f32 %v1442_v14, %v1442_v14  ;;  %v293_v60 = vand.u32 4294901760, %v2210_v38 }
  0x8a   :  { %v277_v21 = vand.u32 4294901760, %v2141_v5 }
  0x8b   :  { %v198_v49 = vsub.f32 %v2097_v43, %v197_v47 }
  0x8c   :  { %v2112_v50 = vpop.permute.xlu0 %75  ;;  %v278_v45 = vsub.f32 %v2141_v5, %v277_v21 }
  0x8d   :  { %v2114_v51 = vpop.permute.xlu1 %48  ;;  %v199_v53 = vand.u32 4294901760, %v198_v49  ;;  %vm96_vm10 = vcmp.eq.s32.totalorder %v1969_v18, %v2112_v50 }
  0x8e   :  { %vm87_vm9 = vcmp.eq.s32.totalorder %v1969_v18, %v2114_v51  ;;  %1463 = vmatmul.msk.f32.gmra.mxu3 %vm94_vm5, %v1593_v28  ;;  %v1449_v30 = vsel %vm96_vm10, 1.0, %v1592_v22  ;;  %v279_v62 = vand.u32 4294901760, %v278_v45 }
  0x8f   :  { %v1440_v0 = vsel %vm87_vm9, 1.0, %v1592_v22  ;;  %1455 = vmatmul.msk.f32.gmra.mxu1 %vm86_vm6, %v1593_v28  ;;  %264 = vmatmul.f32.gmra.mxu2 %v263_v54  ;;  %v2174_v26 = vsub.f32 %v1449_v30, %v1449_v30  ;;  %v229_v54 = vand.u32 4294901760, %v228_v40  ;;  %v294_v30 = vsub.f32 %v2210_v38, %v293_v60 }
  0x90   :  { %200 = vmatmul.f32.gmra.mxu0 %v199_v53  ;;  %v2143_v6 = vsub.f32 %v1440_v0, %v1440_v0 }
  0x91   :  { %v285_v2 = vand.u32 4294901760, %v2174_v26 }
  0x92   :  { %v213_v20 = vand.u32 4294901760, %v2143_v6 }
  0x93   :  { %v286_v48 = vsub.f32 %v2174_v26, %v285_v2 }
  0x94   :  { %v2150_v11 = vpop.permute.xlu0 %51  ;;  %v214_v41 = vsub.f32 %v2143_v6, %v213_v20 }
  0x95   :  { %vm88_vm11 = vcmp.eq.s32.totalorder %v1969_v18, %v2150_v11  ;;  %v2206_v15 = vpop.permute.xlu1 %81  ;;  %v287_v53 = vand.u32 4294901760, %v286_v48 }
  0x96   :  { %v1441_v16 = vsel %vm88_vm11, 1.0, %v1592_v22  ;;  %1464 = vmatmul.msk.f32.gmra.mxu3 %vm95_vm8, %v1593_v28  ;;  %v215_v61 = vand.u32 4294901760, %v214_v41  ;;  %vm98_vm14 = vcmp.eq.s32.totalorder %v1969_v18, %v2206_v15  ;;  %v295_v41 = vand.u32 4294901760, %v294_v30 }
  0x97   :  { %1456 = vmatmul.msk.f32.gmra.mxu1 %vm87_vm9, %v1593_v28  ;;  %272 = vmatmul.f32.gmra.mxu2 %v271_v12  ;;  %v2176_v27 = vsub.f32 %v1441_v16, %v1441_v16  ;;  %v1451_v0 = vsel %vm98_vm14, 1.0, %v1592_v22 }
  0x98   :  { %208 = vmatmul.f32.gmra.mxu0 %v207_v13  ;;  %v2237_v7 = vsub.f32 %v1451_v0, %v1451_v0  ;;  %v230_v13 = vsub.f32 %v228_v40, %v229_v54 }
  0x99   :  { %v221_v63 = vand.u32 4294901760, %v2176_v27 }
  0x9a   :  { %v231_v16 = vand.u32 4294901760, %v230_v13 }
  0x9b   :  { %v222_v42 = vsub.f32 %v2176_v27, %v221_v63 }
  0x9c   :  { %v2208_v37 = vpop.permute.xlu0 %57 }
  0x9d   :  { %vm90_vm15 = vcmp.eq.s32.totalorder %v1969_v18, %v2208_v37  ;;  %v223_v49 = vand.u32 4294901760, %v222_v42 }
  0x9e   :  { %1465 = vmatmul.msk.f32.gmra.mxu3 %vm96_vm10, %v1593_v28  ;;  %v1443_v1 = vsel %vm90_vm15, 1.0, %v1592_v22 }
  0x9f   :  { %1457 = vmatmul.msk.f32.gmra.mxu1 %vm88_vm11, %v1593_v28  ;;  %280 = vmatmul.f32.gmra.mxu2 %v279_v62  ;;  %v236_v12 = vsub.f32 %v1443_v1, %v1443_v1 }
  0xa0   :  { %216 = vmatmul.f32.gmra.mxu0 %v215_v61  ;;  %v301_v61 = vand.u32 4294901760, %v2237_v7 }
  0xa1   :  { %v237_v45 = vand.u32 4294901760, %v236_v12 }
  0xa2   :  { %v302_v4 = vsub.f32 %v2237_v7, %v301_v61 }
  0xa3   :  { %v238_v62 = vsub.f32 %v236_v12, %v237_v45 }
  0xa4   :  { %v303_v42 = vand.u32 4294901760, %v302_v4 }
  0xa5   :  { %v239_v14 = vand.u32 4294901760, %v238_v62 }
  0xa6   :  { %1466 = vmatmul.msk.f32.gmra.mxu3 %vm97_vm12, %v1593_v28 }
  0xa7   :  { %1458 = vmatmul.msk.f32.gmra.mxu1 %vm89_vm13, %v1593_v28  ;;  %288 = vmatmul.f32.gmra.mxu2 %v287_v53 }
  0xa8   :  { %224 = vmatmul.f32.gmra.mxu0 %v223_v49 }
  0xae   :  { %1467 = vmatmul.msk.f32.gmra.mxu3 %vm98_vm14, %v1593_v28 }
  0xaf   :  { %1459 = vmatmul.msk.f32.gmra.mxu1 %vm90_vm15, %v1593_v28  ;;  %296 = vmatmul.f32.gmra.mxu2 %v295_v41  ;;  %v1147_v41 = vpop.permute.xlu0 %1146 }
  0xb0   :  { %232 = vmatmul.f32.gmra.mxu0 %v231_v16 }
  0xb6   :  { %633 = vmatmul.f32.vlgmr.msrb.gmra.mxu3 %v181_v35 }
  0xb7   :  { %1484 = vmatmul.msk.f32.vlgmr.msrb.gmra.mxu1 %vm83_vm2, %v1593_v28  ;;  %304 = vmatmul.f32.gmra.mxu2 %v303_v42 }
  0xb8   :  { %240 = vmatmul.f32.gmra.mxu0 %v239_v14 }
  0xbe   :  { %639 = vmatmul.f32.gmra.mxu3 %v189_v56 }
  0xbf   :  { %1485 = vmatmul.msk.f32.gmra.mxu1 %vm84_vm0, %v1593_v28  ;;  %519 = vmatmul.f32.vlgmr.msrb.gmra.mxu2 %v2015_v33 }
  0xc0   :  { %1468 = vmatmul.msk.f32.vlgmr.msrb.gmra.mxu0 %vm83_vm2, %v1593_v28  ;;  %vm1372_vm2 = vcmask 7168  }
  0xc6   :  { %645 = vmatmul.f32.gmra.mxu3 %v197_v47 }
  0xc7   :  { %1486 = vmatmul.msk.f32.gmra.mxu1 %vm85_vm7, %v1593_v28  ;;  %524 = vmatmul.f32.gmra.mxu2 %v2011_v29 }
  0xc8   :  { %1469 = vmatmul.msk.f32.gmra.mxu0 %vm84_vm0, %v1593_v28  ;;  %vm1193_vm0 = vcmp.eq.s32.totalorder %v1969_v18, %v1147_v41 }
  0xce   :  { %651 = vmatmul.f32.gmra.mxu3 %v205_v55 }
  0xcf   :  { %1487 = vmatmul.msk.f32.gmra.mxu1 %vm86_vm6, %v1593_v28  ;;  %529 = vmatmul.f32.gmra.mxu2 %v2097_v43 }
  0xd0   :  { %1470 = vmatmul.msk.f32.gmra.mxu0 %vm85_vm7, %v1593_v28 }
  0xd6   :  { %657 = vmatmul.f32.gmra.mxu3 %v213_v20 }
  0xd7   :  { %1488 = vmatmul.msk.f32.gmra.mxu1 %vm87_vm9, %v1593_v28  ;;  %534 = vmatmul.f32.gmra.mxu2 %v2101_v46 }
  0xd8   :  { %1471 = vmatmul.msk.f32.gmra.mxu0 %vm86_vm6, %v1593_v28 }
  0xde   :  { %663 = vmatmul.f32.gmra.mxu3 %v221_v63 }
  0xdf   :  { %1489 = vmatmul.msk.f32.gmra.mxu1 %vm88_vm11, %v1593_v28  ;;  %539 = vmatmul.f32.gmra.mxu2 %v2143_v6 }
  0xe0   :  { %1472 = vmatmul.msk.f32.gmra.mxu0 %vm87_vm9, %v1593_v28 }
  0xe6   :  { %669 = vmatmul.f32.gmra.mxu3 %v229_v54 }
  0xe7   :  { %1490 = vmatmul.msk.f32.gmra.mxu1 %vm89_vm13, %v1593_v28  ;;  %544 = vmatmul.f32.gmra.mxu2 %v2176_v27 }
  0xe8   :  { %1473 = vmatmul.msk.f32.gmra.mxu0 %vm88_vm11, %v1593_v28 }
  0xee   :  { %675 = vmatmul.f32.gmra.mxu3 %v237_v45 }
  0xef   :  { %1491 = vmatmul.msk.f32.gmra.mxu1 %vm90_vm15, %v1593_v28  ;;  %549 = vmatmul.f32.gmra.mxu2 %v228_v40 }
  0xf0   :  { %1474 = vmatmul.msk.f32.gmra.mxu0 %vm89_vm13, %v1593_v28 }
  0xf4   :  { %v2330_v17 = vpop.f32.mrf.mxu1 }
  0xf6   :  { %681 = vmatmul.f32.gmra.mxu3 %v245_v36 }
  0xf7   :  { %1492 = vmatmul.msk.f32.gmra.mxu1 %vm91_vm1, %v1593_v28  ;;  %554 = vmatmul.f32.gmra.mxu2 %v236_v12 }
  0xf8   :  { %1475 = vmatmul.msk.f32.gmra.mxu0 %vm90_vm15, %v1593_v28 }
  0xf9   :  { %v438_v25 = vpop.f32.mrf.mxu3 }
  0xfc   :  { %v2342_v29 = vpop.f32.mrf.mxu1 }
  0xfd   :  { %v2344_v33 = vpop.f32.mrf.mxu0 }
  0xfe   :  { %687 = vmatmul.f32.gmra.mxu3 %v253_v9  ;;  %v407_v54 = vadd.f32 %v2330_v17, %v2344_v33  ;;  %v1500_v17 = vsel %vm1193_vm0, 1.0, %v1592_v22 }
  0xff   :  { %1493 = vmatmul.msk.f32.gmra.mxu1 %vm92_vm3, %v1593_v28  ;;  %559 = vmatmul.f32.gmra.mxu2 %v2013_v32 }
 0x100   :  { %1476 = vmatmul.msk.f32.gmra.mxu0 %vm91_vm1, %v1593_v28 }
 0x101   :  { %v442_v35 = vpop.f32.mrf.mxu3 }
 0x102   :  { %v249_v36 = vpop.f32.mrf.mxu2 }
 0x103   :  { %v2357_v56 = vadd.f32 %v438_v25, %v249_v36 }
 0x104   :  { %v2359_v10 = vpop.f32.mrf.mxu1 }
 0x105   :  { %v2361_v19 = vpop.f32.mrf.mxu0 }
 0x106   :  { %693 = vmatmul.f32.gmra.mxu3 %v261_v39  ;;  %v411_v15 = vadd.f32 %v2342_v29, %v2361_v19 }
 0x107   :  { %1494 = vmatmul.msk.f32.gmra.mxu1 %vm93_vm4, %v1593_v28  ;;  %564 = vmatmul.f32.gmra.mxu2 %v2053_v3 }
 0x108   :  { %1477 = vmatmul.msk.f32.gmra.mxu0 %vm92_vm3, %v1593_v28  ;;  %vm1414_vm3 = vcmask 0  }
 0x109   :  { %v446_v24 = vpop.f32.mrf.mxu3 }
 0x10a   :  { %v257_v32 = vpop.f32.mrf.mxu2 }
 0x10b   :  { %v2374_v9 = vadd.f32 %v442_v35, %v257_v32 }
 0x10c   :  { %v2376_v43 = vpop.f32.mrf.mxu1 }
 0x10d   :  { %v2378_v46 = vpop.f32.mrf.mxu0 }
 0x10e   :  { %699 = vmatmul.f32.gmra.mxu3 %v269_v52  ;;  %v415_v25 = vadd.f32 %v2359_v10, %v2378_v46 }
 0x10f   :  { %1495 = vmatmul.msk.f32.gmra.mxu1 %vm94_vm5, %v1593_v28  ;;  %569 = vmatmul.f32.gmra.mxu2 %v2058_v8 }
 0x110   :  { %1478 = vmatmul.msk.f32.gmra.mxu0 %vm93_vm4, %v1593_v28 }
 0x111   :  { %v450_v58 = vpop.f32.mrf.mxu3 }
 0x112   :  { %v265_v3 = vpop.f32.mrf.mxu2 }
 0x113   :  { %v2391_v39 = vadd.f32 %v446_v24, %v265_v3 }
 0x114   :  { %v2393_v47 = vpop.f32.mrf.mxu1 }
 0x115   :  { %v2395_v51 = vpop.f32.mrf.mxu0 }
 0x116   :  { %705 = vmatmul.f32.gmra.mxu3 %v277_v21  ;;  %v419_v10 = vadd.f32 %v2376_v43, %v2395_v51 }
 0x117   :  { %1496 = vmatmul.msk.f32.gmra.mxu1 %vm95_vm8, %v1593_v28  ;;  %574 = vmatmul.f32.gmra.mxu2 %v2099_v44 }
 0x118   :  { %1479 = vmatmul.msk.f32.gmra.mxu0 %vm94_vm5, %v1593_v28 }
 0x119   :  { %v454_v59 = vpop.f32.mrf.mxu3 }
 0x11a   :  { %v273_v8 = vpop.f32.mrf.mxu2 }
 0x11b   :  { %v2408_v52 = vadd.f32 %v450_v58, %v273_v8 }
 0x11c   :  { %v2410_v55 = vpop.f32.mrf.mxu1 }
 0x11d   :  { %v2412_v6 = vpop.f32.mrf.mxu0 }
 0x11e   :  { %711 = vmatmul.f32.gmra.mxu3 %v285_v2 }
 0x11f   :  { %1497 = vmatmul.msk.f32.gmra.mxu1 %vm96_vm10, %v1593_v28  ;;  %579 = vmatmul.f32.gmra.mxu2 %v2141_v5 }
 0x120   :  { %1480 = vmatmul.msk.f32.gmra.mxu0 %vm95_vm8, %v1593_v28 }
 0x121   :  { %v458_v34 = vpop.f32.mrf.mxu3 }
 0x122   :  { %v281_v44 = vpop.f32.mrf.mxu2 }
 0x123   :  { %v2425_v11 = vadd.f32 %v454_v59, %v281_v44 }
 0x124   :  { %v2427_v20 = vpop.f32.mrf.mxu1 }
 0x125   :  { %v2429_v21 = vpop.f32.mrf.mxu0 }
 0x126   :  { %717 = vmatmul.f32.gmra.mxu3 %v293_v60 }
 0x127   :  { %1498 = vmatmul.msk.f32.gmra.mxu1 %vm97_vm12, %v1593_v28  ;;  %584 = vmatmul.f32.gmra.mxu2 %v2174_v26 }
 0x128   :  { %1481 = vmatmul.msk.f32.gmra.mxu0 %vm96_vm10, %v1593_v28 }
 0x129   :  { %v462_v31 = vpop.f32.mrf.mxu3 }
 0x12a   :  { %v289_v5 = vpop.f32.mrf.mxu2 }
 0x12b   :  { %v2442_v23 = vadd.f32 %v458_v34, %v289_v5 }
 0x12c   :  { %v2444_v27 = vpop.f32.mrf.mxu1 }
 0x12d   :  { %v2446_v63 = vpop.f32.mrf.mxu0 }
 0x12e   :  { %723 = vmatmul.f32.gmra.mxu3 %v301_v61 }
 0x12f   :  { %1499 = vmatmul.msk.f32.gmra.mxu1 %vm98_vm14, %v1593_v28  ;;  %589 = vmatmul.f32.gmra.mxu2 %v2210_v38 }
 0x130   :  { %1482 = vmatmul.msk.f32.gmra.mxu0 %vm97_vm12, %v1593_v28 }
 0x131   :  { %v466_v50 = vpop.f32.mrf.mxu3 }
 0x132   :  { %v297_v26 = vpop.f32.mrf.mxu2 }
 0x133   :  { %v2459_v2 = vadd.f32 %v462_v31, %v297_v26  ;;  %v423_v26 = vadd.f32 %v2393_v47, %v2412_v6 }
 0x134   :  { %v890_v37 = vpop.f32.mrf.mxu1 }
 0x135   :  { %v2461_v40 = vpop.f32.mrf.mxu0 }
 0x137   :  { %594 = vmatmul.f32.gmra.mxu2 %v2237_v7 }
 0x138   :  { %1483 = vmatmul.msk.f32.gmra.mxu0 %vm98_vm14, %v1593_v28 }
 0x139   :  { %v634_v38 = vpop.f32.mrf.mxu3 }
 0x13a   :  { %v305_v48 = vpop.f32.mrf.mxu2 }
 0x13b   :  { %v2468_v49 = vadd.f32 %v466_v50, %v305_v48 }
 0x13c   :  { %v894_v57 = vpop.f32.mrf.mxu1 }
 0x13d   :  { %v793_v53 = vpop.f32.mrf.mxu0 }
 0x141   :  { %v640_v60 = vpop.f32.mrf.mxu3 }
 0x142   :  { %v520_v0 = vpop.f32.mrf.mxu2 }
 0x143   :  { %v521_v1 = vadd.f32 %v520_v0, %v407_v54 }
 0x144   :  { %v898_v12 = vpop.f32.mrf.mxu1 }
 0x145   :  { %v797_v13 = vpop.f32.mrf.mxu0  ;;  %v635_v7 = vadd.f32 %v634_v38, %v521_v1 }
 0x147   :  { %v794_v30 = vadd.f32 %v793_v53, %v635_v7 }
 0x149   :  { %v2474_v28 = vadd.f32 %v890_v37, %v794_v30  ;;  %v646_v16 = vpop.f32.mrf.mxu3 }
 0x14a   :  { %v525_v45 = vpop.f32.mrf.mxu2 }
 0x14b   :  { %953 = vst [vmem:[%s2564_s3] sm:$0xff] %v2474_v28  ;;  %v526_v61 = vadd.f32 %v525_v45, %v411_v15  ;;  %969 = vmax.xlane.f32.xlu1 %v2474_v28  ;;  %v1241_v35 = vmul.f32 %v1500_v17, %v2474_v28  ;;  %v431_v15 = vadd.f32 %v2427_v20, %v2446_v63 }
 0x14c   :  { %v902_v62 = vpop.f32.mrf.mxu1 }
 0x14d   :  { %v801_v4 = vpop.f32.mrf.mxu0  ;;  %v641_v14 = vadd.f32 %v640_v60, %v526_v61  ;;  %v427_v60 = vadd.f32 %v2410_v55, %v2429_v21 }
 0x14f   :  { %v798_v42 = vadd.f32 %v797_v13, %v641_v14 }
 0x151   :  { %v2485_v29 = vadd.f32 %v894_v57, %v798_v42  ;;  %v652_v33 = vpop.f32.mrf.mxu3 }
 0x152   :  { %v530_v36 = vpop.f32.mrf.mxu2 }
 0x153   :  { %954 = vst [vmem:[%s2564_s3 + $0x8] sm:$0xff] %v2485_v29  ;;  %v531_v19 = vadd.f32 %v530_v36, %v415_v25  ;;  %971 = vmax.xlane.f32.xlu2 %v2485_v29  ;;  %1257 = vadd.xlane.f32.xlu1 %v1241_v35 }
 0x154   :  { %v906_v24 = vpop.f32.mrf.mxu1 }
 0x155   :  { %v805_v32 = vpop.f32.mrf.mxu0  ;;  %v647_v58 = vadd.f32 %v646_v16, %v531_v19 }
 0x157   :  { %v802_v3 = vadd.f32 %v801_v4, %v647_v58  ;;  %v435_v4 = vadd.f32 %v2444_v27, %v2461_v40 }
 0x159   :  { %v899_v46 = vadd.f32 %v898_v12, %v802_v3  ;;  %v658_v59 = vpop.f32.mrf.mxu3 }
 0x15a   :  { %v535_v8 = vpop.f32.mrf.mxu2 }
 0x15b   :  { %955 = vst [vmem:[%s2564_s3 + $0x10] sm:$0xff] %v899_v46  ;;  %v536_v34 = vadd.f32 %v535_v8, %v419_v10 }
 0x15c   :  { %v910_v44 = vpop.f32.mrf.mxu1 }
 0x15d   :  { %v809_v31 = vpop.f32.mrf.mxu0  ;;  %v653_v5 = vadd.f32 %v652_v33, %v536_v34 }
 0x15f   :  { %v806_v50 = vadd.f32 %v805_v32, %v653_v5 }
 0x161   :  { %v903_v37 = vadd.f32 %v902_v62, %v806_v50  ;;  %v664_v38 = vpop.f32.mrf.mxu3 }
 0x162   :  { %v540_v48 = vpop.f32.mrf.mxu2 }
 0x163   :  { %956 = vst [vmem:[%s2564_s3 + $0x18] sm:$0xff] %v903_v37  ;;  %v541_v43 = vadd.f32 %v540_v48, %v423_v26 }
 0x164   :  { %v914_v53 = vpop.f32.mrf.mxu1 }
 0x165   :  { %v813_v51 = vpop.f32.mrf.mxu0  ;;  %v659_v57 = vadd.f32 %v658_v59, %v541_v43 }
 0x167   :  { %v810_v54 = vadd.f32 %v809_v31, %v659_v57 }
 0x169   :  { %v907_v0 = vadd.f32 %v906_v24, %v810_v54  ;;  %v670_v1 = vpop.f32.mrf.mxu3 }
 0x16a   :  { %v545_v12 = vpop.f32.mrf.mxu2 }
 0x16b   :  { %957 = vst [vmem:[%s2564_s3 + $0x20] sm:$0xff] %v907_v0  ;;  %v546_v47 = vadd.f32 %v545_v12, %v427_v60 }
 0x16c   :  { %v918_v30 = vpop.f32.mrf.mxu1 }
 0x16d   :  { %v817_v6 = vpop.f32.mrf.mxu0  ;;  %v665_v13 = vadd.f32 %v664_v38, %v546_v47 }
 0x16f   :  { %v814_v7 = vadd.f32 %v813_v51, %v665_v13 }
 0x171   :  { %v911_v16 = vadd.f32 %v910_v44, %v814_v7  ;;  %v676_v41 = vpop.f32.mrf.mxu3 }
 0x172   :  { %v550_v45 = vpop.f32.mrf.mxu2 }
 0x173   :  { %958 = vst [vmem:[%s2564_s3 + $0x28] sm:$0xff] %v911_v16  ;;  %v551_v55 = vadd.f32 %v550_v45, %v431_v15 }
 0x174   :  { %v922_v17 = vpop.f32.mrf.mxu1 }
 0x175   :  { %v821_v21 = vpop.f32.mrf.mxu0  ;;  %v671_v61 = vadd.f32 %v670_v1, %v551_v55 }
 0x177   :  { %v818_v62 = vadd.f32 %v817_v6, %v671_v61 }
 0x179   :  { %v915_v14 = vadd.f32 %v914_v53, %v818_v62  ;;  %v682_v42 = vpop.f32.mrf.mxu3 }
 0x17a   :  { %v555_v25 = vpop.f32.mrf.mxu2 }
 0x17b   :  { %959 = vst [vmem:[%s2564_s3 + $0x30] sm:$0xff] %v915_v14  ;;  %v556_v20 = vadd.f32 %v555_v25, %v435_v4 }
 0x17c   :  { %v926_v40 = vpop.f32.mrf.mxu1 }
 0x17d   :  { %v825_v63 = vpop.f32.mrf.mxu0  ;;  %v677_v33 = vadd.f32 %v676_v41, %v556_v20 }
 0x17f   :  { %v822_v35 = vadd.f32 %v821_v21, %v677_v33 }
 0x181   :  { %v919_v36 = vadd.f32 %v918_v30, %v822_v35  ;;  %v688_v19 = vpop.f32.mrf.mxu3 }
 0x182   :  { %v560_v24 = vpop.f32.mrf.mxu2 }
 0x183   :  { %960 = vst [vmem:[%s2564_s3 + $0x38] sm:$0xff] %v919_v36  ;;  %v561_v27 = vadd.f32 %v560_v24, %v2357_v56 }
 0x184   :  { %v930_v31 = vpop.f32.mrf.mxu1 }
 0x185   :  { %v829_v32 = vpop.f32.mrf.mxu0  ;;  %v683_v58 = vadd.f32 %v682_v42, %v561_v27 }
 0x187   :  { %v826_v3 = vadd.f32 %v825_v63, %v683_v58 }
 0x189   :  { %v923_v10 = vadd.f32 %v922_v17, %v826_v3  ;;  %v694_v46 = vpop.f32.mrf.mxu3 }
 0x18a   :  { %v565_v59 = vpop.f32.mrf.mxu2 }
 0x18b   :  { %961 = vst [vmem:[%s2564_s3 + $0x40] sm:$0xff] %v923_v10  ;;  %v566_v8 = vadd.f32 %v565_v59, %v2374_v9  ;;  %v1150_v59 = vpop.permute.xlu0 %1149 }
 0x18c   :  { %v934_v51 = vpop.f32.mrf.mxu1  ;;  %vm1194_vm1 = vcmp.eq.s32.totalorder %v1969_v18, %v1150_v59 }
 0x18d   :  { %v833_v34 = vpop.f32.mrf.mxu0  ;;  %v689_v44 = vadd.f32 %v688_v19, %v566_v8 }
 0x18f   :  { %v830_v5 = vadd.f32 %v829_v32, %v689_v44 }
 0x191   :  { %v927_v50 = vadd.f32 %v926_v40, %v830_v5  ;;  %v700_v37 = vpop.f32.mrf.mxu3 }
 0x192   :  { %v570_v26 = vpop.f32.mrf.mxu2 }
 0x193   :  { %962 = vst [vmem:[%s2564_s3 + $0x48] sm:$0xff] %v927_v50  ;;  %v571_v56 = vadd.f32 %v570_v26, %v2391_v39 }
 0x194   :  { %v938_v47 = vpop.f32.mrf.mxu1 }
 0x195   :  { %v695_v38 = vadd.f32 %v694_v46, %v571_v56  ;;  %v837_v48 = vpop.f32.mrf.mxu0 }
 0x197   :  { %v834_v43 = vadd.f32 %v833_v34, %v695_v38 }
 0x199   :  { %v931_v57 = vadd.f32 %v930_v31, %v834_v43  ;;  %v706_v60 = vpop.f32.mrf.mxu3 }
 0x19a   :  { %v575_v53 = vpop.f32.mrf.mxu2 }
 0x19b   :  { %963 = vst [vmem:[%s2564_s3 + $0x50] sm:$0xff] %v931_v57  ;;  %v576_v9 = vadd.f32 %v575_v53, %v2408_v52 }
 0x19c   :  { %v942_v45 = vpop.f32.mrf.mxu1 }
 0x19d   :  { %v701_v54 = vadd.f32 %v700_v37, %v576_v9  ;;  %v841_v1 = vpop.f32.mrf.mxu0 }
 0x19f   :  { %v838_v0 = vadd.f32 %v837_v48, %v701_v54 }
 0x1a1   :  { %v935_v12 = vadd.f32 %v934_v51, %v838_v0  ;;  %v712_v30 = vpop.f32.mrf.mxu3 }
 0x1a2   :  { %v580_v39 = vpop.f32.mrf.mxu2 }
 0x1a3   :  { %964 = vst [vmem:[%s2564_s3 + $0x58] sm:$0xff] %v935_v12  ;;  %v581_v6 = vadd.f32 %v580_v39, %v2425_v11 }
 0x1a4   :  { %v946_v17 = vpop.f32.mrf.mxu1 }
 0x1a5   :  { %v707_v13 = vadd.f32 %v706_v60, %v581_v6  ;;  %v845_v16 = vpop.f32.mrf.mxu0 }
 0x1a7   :  { %v842_v7 = vadd.f32 %v841_v1, %v707_v13 }
 0x1a9   :  { %v939_v15 = vadd.f32 %v938_v47, %v842_v7  ;;  %v718_v62 = vpop.f32.mrf.mxu3 }
 0x1aa   :  { %v585_v41 = vpop.f32.mrf.mxu2 }
 0x1ab   :  { %965 = vst [vmem:[%s2564_s3 + $0x60] sm:$0xff] %v939_v15  ;;  %v586_v52 = vadd.f32 %v585_v41, %v2442_v23 }
 0x1ad   :  { %v713_v55 = vadd.f32 %v712_v30, %v586_v52  ;;  %v849_v14 = vpop.f32.mrf.mxu0 }
 0x1af   :  { %v846_v21 = vadd.f32 %v845_v16, %v713_v55 }
 0x1b1   :  { %v943_v61 = vadd.f32 %v942_v45, %v846_v21  ;;  %v724_v33 = vpop.f32.mrf.mxu3 }
 0x1b2   :  { %v590_v4 = vpop.f32.mrf.mxu2 }
 0x1b3   :  { %966 = vst [vmem:[%s2564_s3 + $0x68] sm:$0xff] %v943_v61  ;;  %v591_v11 = vadd.f32 %v590_v4, %v2459_v2  ;;  %v950_v2 = vpop.f32.mrf.mxu1 }
 0x1b5   :  { %v719_v42 = vadd.f32 %v718_v62, %v591_v11  ;;  %v853_v36 = vpop.f32.mrf.mxu0 }
 0x1b7   :  { %v850_v25 = vadd.f32 %v849_v14, %v719_v42 }
 0x1b9   :  { %v947_v20 = vadd.f32 %v946_v17, %v850_v25 }
 0x1ba   :  { %v595_v63 = vpop.f32.mrf.mxu2 }
 0x1bb   :  { %967 = vst [vmem:[%s2564_s3 + $0x70] sm:$0xff] %v947_v20  ;;  %v596_v23 = vadd.f32 %v595_v63, %v2468_v49 }
 0x1bd   :  { %v725_v35 = vadd.f32 %v724_v33, %v596_v23 }
 0x1be   :  { %v970_v19 = vpop.xlane.xlu1 %969 }
 0x1bf   :  { %v854_v24 = vadd.f32 %v853_v36, %v725_v35  ;;  %v1001_v27 = vsub.f32 %v2474_v28, %v970_v19  ;;  %v1501_v28 = vsel %vm1194_vm1, 1.0, %v1592_v22 }
 0x1c0   :  { %v1242_v8 = vmul.f32 %v1501_v28, %v2485_v29 }
 0x1c1   :  { %v951_v40 = vadd.f32 %v950_v2, %v854_v24  ;;  %v1017_v32 = vmul.f32 1.442695, %v1001_v27 }
 0x1c3   :  { %968 = vst [vmem:[%s2564_s3 + $0x78] sm:$0xff] %v951_v40  ;;  %1557 = vpow2.f32 %v1017_v32  ;;  %s1594_s3 = smov [#allocation2]  }
 0x1c4   :  { %s1423_s5 = sshll.u32 %s1594_s3, 4  ;;  %s1424_s5 = int_to_ptr.vmem [resolvable:$true] %s1423_s5 }
 0x1c6   :  { %v972_v58 = vpop.xlane.xlu2 %971  ;;  %v1258_v37 = vpop.xlane.xlu1 %1257 }
 0x1c7   :  { %v1002_v3 = vsub.f32 %v2485_v29, %v972_v58 }
 0x1c9   :  { %v1558_v10 = vpop.eup %1557  ;;  %v1019_v49 = vmul.f32 1.442695, %v1002_v3 }
 0x1ca   :  { %1049 = vadd.xlane.f32.xlu0 %v1558_v10 }
 0x1cb   :  { %1559 = vpow2.f32 %v1019_v49 }
 0x1d1   :  { %v1560_v46 = vpop.eup %1559 }
 0x1d2   :  { %1051 = vadd.xlane.f32.xlu2 %v1560_v46 }
 0x1da   :  { %1259 = vadd.xlane.f32.xlu2 %v1242_v8 }
 0x23d   :  { %v1050_v34 = vpop.xlane.xlu0 %1049 }
 0x23e   :  { %1561 = vlog2.f32 %v1050_v34 }
 0x244   :  { %v1562_v44 = vpop.eup %1561 }
 0x245   :  { %v1052_v31 = vpop.xlane.xlu2 %1051  ;;  %v1082_v5 = vmul.f32 0.6931472, %v1562_v44 }
 0x246   :  { %1563 = vlog2.f32 %v1052_v31 }
 0x247   :  { %v1113_v50 = vadd.f32 %v1082_v5, %v970_v19 }
 0x249   :  { %v1289_v48 = vsub.f32 %v1113_v50, %v1258_v37 }
 0x24b   :  { %v1373_v51 = vsel %vm1372_vm2, %v1289_v48, 0.0 }
 0x24c   :  { %v1564_v26 = vpop.eup %1563 }
 0x24d   :  { %v1084_v56 = vmul.f32 0.6931472, %v1564_v26  ;;  %v1260_v43 = vpop.xlane.xlu2 %1259 }
 0x24f   :  { %v1114_v38 = vadd.f32 %v1084_v56, %v972_v58 }
 0x251   :  { %v1290_v18 = vsub.f32 %v1114_v38, %v1260_v43 }
 0x253   :  { %v1374_v22 = vsel %vm1372_vm2, %v1290_v18, 0.0 }
 0x254   :  { %v1375_v57 = vadd.f32 %v1374_v22, %v1373_v51 }
 0x256   :  { %1404 = vadd.xlane.f32.xlu1 %v1375_v57 }
 0x2c9   :  { %v1405_v29 = vpop.xlane.xlu1 %1404 }
 0x2ca   :  { %v1406_v53 = vrot.slane %v1405_v29, 4 }
 0x2cc   :  { %v1407_v9 = vadd.f32 %v1406_v53, %v1405_v29 }
 0x2ce   :  { %v1408_v54 = vrot.slane %v1407_v9, 2 }
 0x2d0   :  { %v1409_v60 = vadd.f32 %v1408_v54, %v1407_v9 }
 0x2d2   :  { %v1410_v0 = vrot.slane %v1409_v60, 1 }
 0x2d4   :  { %v1411_v1 = vadd.f32 %v1410_v0, %v1409_v60 }
 0x2d6   :  { %1548 = vpush %v1411_v1 }
 0x307   :  { %s1549_s8 = spop %1548 }
 0x308   :  { %v1413_v12 = vstv %s1549_s8 }
 0x309   :  { %1415 = vst.msk [vmem:[#allocation2] sm:$0x1] %vm1414_vm3, %v1413_v12 }
 0x30a   :  { %1428 = dma.vmem_to_hbm [thread:$0]  %s1424_s5, 16, %s1426_s7, [#allocation3]  }
 0x30b   :  { %1589 = dma.done.wait [#allocation3], 16  }
 0x30c   :  { %1590 = vsyncadd [#allocation3], 4294967280 }
 0x30d   :  { %1435 = vsyncpa [#allocation3], 1 }

</bundles_post_ra>
